<compile_context>
chip_gen: v7x
topology: tpu7x:2x2x1
jax: 0.10.0
libtpu: 0.0.40
codegen_flags: <defaults>
</compile_context>

<pallas_src>
import jax
import jax.numpy as jnp
from jax.experimental import pallas as pl
from jax.experimental.pallas import tpu as pltpu

# torchaudio.transforms.AmplitudeToDB() defaults: stype="power" -> multiplier=10,
# amin=1e-10, ref_value=1.0 -> db_multiplier = log10(max(amin, ref)) = 0,
# top_db=None -> no clamping.
_AMIN = 1e-10
_MULT = 10.0

_LANE = 512         # lane-dense last dim (multiple of 128) -> wide unmasked stores
_BLOCK_ROWS = 512   # (512, 512) f32 = 1 MiB per block


def _minmax_kernel(x_ref, mn_ref, mx_ref):
    """Pass 1: per-block partial min/max of the *raw* input (monotonicity trick)."""
    x = x_ref[...].astype(jnp.float32)
    mn_ref[...] = jnp.full(mn_ref.shape, jnp.min(x), dtype=jnp.float32)
    mx_ref[...] = jnp.full(mx_ref.shape, jnp.max(x), dtype=jnp.float32)


def _normalize_kernel(scale_ref, x_ref, out_ref):
    """Pass 2: recompute dB and normalize. scale_ref (SMEM) = [db_min, 1/(db_max-db_min)]."""
    x = x_ref[...].astype(jnp.float32)
    db = _MULT * jnp.log10(jnp.maximum(x, _AMIN))
    out_ref[...] = (db - scale_ref[0]) * scale_ref[1]


def normalize(x):
    """JAX/Pallas equivalent of the PyTorch Normalize module. x: NCHW float array."""
    orig_shape = x.shape
    flat = x.reshape(-1)            # keep original dtype; cast inside kernels
    n = flat.shape[0]

    # Flatten -> (rows, _LANE). Tail padding replicates existing values (edge),
    # so it cannot change the global min/max; padded outputs are dropped later.
    lane_pad = (-n) % _LANE
    if lane_pad:
        flat = jnp.pad(flat, (0, lane_pad), mode="edge")
    x2d = flat.reshape(-1, _LANE)
    rows = x2d.shape[0]

    if rows <= _BLOCK_ROWS:
        block_rows = rows           # single block: block dim == full dim is always legal
    else:
        block_rows = _BLOCK_ROWS    # multiple of 8
        row_pad = (-rows) % block_rows
        if row_pad:
            x2d = jnp.pad(x2d, ((0, row_pad), (0, 0)), mode="edge")
            rows = x2d.shape[0]
    num_blocks = rows // block_rows

    x_spec = pl.BlockSpec((block_rows, _LANE), lambda i: (i, 0))

    # ---- pass 1: parallel per-block partial min/max of x --------------------
    mn_part, mx_part = pl.pallas_call(
        _minmax_kernel,
        out_shape=(
            jax.ShapeDtypeStruct((num_blocks, 8, 128), jnp.float32),
            jax.ShapeDtypeStruct((num_blocks, 8, 128), jnp.float32),
        ),
        grid=(num_blocks,),
        in_specs=[x_spec],
        out_specs=(
            pl.BlockSpec((1, 8, 128), lambda i: (i, 0, 0)),
            pl.BlockSpec((1, 8, 128), lambda i: (i, 0, 0)),
        ),
        compiler_params=pltpu.CompilerParams(dimension_semantics=("parallel",)),
    )(x2d)

    # Tiny epilogue on the partials (outside the kernel).
    x_min = jnp.min(mn_part)
    x_max = jnp.max(mx_part)
    db_min = _MULT * jnp.log10(jnp.maximum(x_min, _AMIN))
    db_max = _MULT * jnp.log10(jnp.maximum(x_max, _AMIN))
    # NaN/Inf on constant input, matching PyTorch / the pure-JAX reference.
    inv = 1.0 / (db_max - db_min)
    scale = jnp.stack([db_min, inv]).astype(jnp.float32)   # shape (2,)

    # ---- pass 2: parallel dB + normalize, scalars resident in SMEM ----------
    out2d = pl.pallas_call(
        _normalize_kernel,
        out_shape=jax.ShapeDtypeStruct(x2d.shape, jnp.float32),
        grid=(num_blocks,),
        in_specs=[
            pl.BlockSpec(memory_space=pltpu.SMEM),  # [db_min, inv], untiled
            x_spec,
        ],
        out_specs=x_spec,
        compiler_params=pltpu.CompilerParams(dimension_semantics=("parallel",)),
    )(scale, x2d)

    return out2d.reshape(-1)[:n].reshape(orig_shape)


def _reference(x):
    """Pure-JAX reference of the PyTorch forward pass."""
    db = _MULT * jnp.log10(jnp.maximum(x.astype(jnp.float32), _AMIN))
    return (db - db.min()) / (db.max() - db.min())


if __name__ == "__main__":
    key = jax.random.PRNGKey(0)
    # Power-spectrogram-like positive input, NCHW.
    x = jax.random.uniform(key, (2, 4, 16, 16), dtype=jnp.float32,
                           minval=1e-6, maxval=10.0)

    out = jax.block_until_ready(normalize(x))

    ref = _reference(x)
    assert out.shape == x.shape and out.dtype == jnp.float32
    assert jnp.allclose(out, ref, atol=1e-5, rtol=1e-5), "mismatch vs reference"
    print("KERNEL_OK")
</pallas_src>

<mosaic_0001>
module attributes {stable_mosaic.version = 11 : i64} {
  func.func @_minmax_kernel(%arg0: i32, %arg1: memref<4x512xf32, #tpu.memory_space<vmem>>, %arg2: memref<1x8x128xf32, #tpu.memory_space<vmem>>, %arg3: memref<1x8x128xf32, #tpu.memory_space<vmem>>) attributes {dimension_semantics = [#tpu.dimension_semantics<parallel>], iteration_bounds = array<i64: 1>, scalar_prefetch = 0 : i64, scratch_operands = 0 : i64, tpu.core_type = #tpu.core_type<tc>, window_params = [{transform_indices = @transform_0, window_bounds = array<i64: 4, 512>}, {transform_indices = @transform_1, window_bounds = array<i64: 1, 8, 128>}, {transform_indices = @transform_2, window_bounds = array<i64: 1, 8, 128>}]} {
    %c0 = arith.constant 0 : index
    %c0_0 = arith.constant 0 : index
    %0 = vector.load %arg1[%c0, %c0_0] : memref<4x512xf32, #tpu.memory_space<vmem>>, vector<4x512xf32>
    %1 = vector.shape_cast %0 : vector<4x512xf32> to vector<1x4x512xf32>
    %cst = arith.constant dense<0x7F800000> : vector<1xf32>
    %2 = vector.multi_reduction <minimumf>, %1, %cst [1, 2] : vector<1x4x512xf32> to vector<1xf32>
    %3 = vector.shape_cast %2 : vector<1xf32> to vector<1x1x1xf32>
    %4 = vector.extract %3[0, 0, 0] : f32 from vector<1x1x1xf32>
    %5 = vector.broadcast %4 : f32 to vector<1x8x128xf32>
    %c0_1 = arith.constant 0 : index
    %c0_2 = arith.constant 0 : index
    %c0_3 = arith.constant 0 : index
    %6 = vector.load %arg2[%c0_1, %c0_2, %c0_3] : memref<1x8x128xf32, #tpu.memory_space<vmem>>, vector<1x8x128xf32>
    tpu.vector_store %arg2[%c0_1, %c0_2, %c0_3], %5 {strides = array<i32>} : memref<1x8x128xf32, #tpu.memory_space<vmem>>, vector<1x8x128xf32>,
    %7 = vector.shape_cast %0 : vector<4x512xf32> to vector<1x4x512xf32>
    %cst_4 = arith.constant dense<0xFF800000> : vector<1xf32>
    %8 = vector.multi_reduction <maximumf>, %7, %cst_4 [1, 2] : vector<1x4x512xf32> to vector<1xf32>
    %9 = vector.shape_cast %8 : vector<1xf32> to vector<1x1x1xf32>
    %10 = vector.extract %9[0, 0, 0] : f32 from vector<1x1x1xf32>
    %11 = vector.broadcast %10 : f32 to vector<1x8x128xf32>
    %c0_5 = arith.constant 0 : index
    %c0_6 = arith.constant 0 : index
    %c0_7 = arith.constant 0 : index
    %12 = vector.load %arg3[%c0_5, %c0_6, %c0_7] : memref<1x8x128xf32, #tpu.memory_space<vmem>>, vector<1x8x128xf32>
    tpu.vector_store %arg3[%c0_5, %c0_6, %c0_7], %11 {strides = array<i32>} : memref<1x8x128xf32, #tpu.memory_space<vmem>>, vector<1x8x128xf32>,
    return
  }
  func.func @transform_0(%arg0: i32) -> (i32, i32) {
    %c0_i32 = arith.constant 0 : i32
    %c0_i32_0 = arith.constant 0 : i32
    return %arg0, %c0_i32 : i32, i32
  }
  func.func @transform_1(%arg0: i32) -> (i32, i32, i32) {
    %c0_i32 = arith.constant 0 : i32
    %c0_i32_0 = arith.constant 0 : i32
    %c0_i32_1 = arith.constant 0 : i32
    return %arg0, %c0_i32, %c0_i32_0 : i32, i32, i32
  }
  func.func @transform_2(%arg0: i32) -> (i32, i32, i32) {
    %c0_i32 = arith.constant 0 : i32
    %c0_i32_0 = arith.constant 0 : i32
    %c0_i32_1 = arith.constant 0 : i32
    return %arg0, %c0_i32, %c0_i32_0 : i32, i32, i32
  }
}

</mosaic_0001>

<bundles_post_ra>
// kernel: tpu_custom_call.1
= control target key start
LH: loop header
LB: loop body
LE: loop exit
PB: predicated region body
PF: predicated region fallthrough
CT: control target
= control target key end

     0   :  { %8 = vsyncpa [#allocation3], 0  ;;  %s233_s0 = inlined_call_operand.hbm [shape: f32[4,512], index: 0, kind: input, shape index: {}]   ;;  %s234_s1 = inlined_call_operand.hbm [shape: f32[1,8,128], index: 1, kind: output, shape index: {0}]   ;;  %s235_s2 = inlined_call_operand.hbm [shape: f32[1,8,128], index: 2, kind: output, shape index: {1}]  }
   0x1   :  { %9 = vsyncpa [#allocation4], 0 }
   0x2   :  { %10 = vsyncpa [#allocation7], 0  ;;  %s179_s9 = smov [#allocation2]   ;;  %s107_s13 = scalar_lea.hbm %s233_s0, 256 }
   0x3   :  { %s17_s10 = sshll.u32 %s179_s9, 4  ;;  %p108_p0 = scmp.ne.s32.totalorder %s233_s0, %s107_s13  ;;  %s18_s10 = int_to_ptr.vmem [resolvable:$true] %s17_s10 }
   0x4   :  { %p111_p1 = scmp.lt.u32.totalorder %s107_s13, %s233_s0 }
   0x6   :  { %p113_p2 = pnand %p111_p1, %p108_p0 }
   0x8   :  { %116 = shalt.err (!%p113_p2)
}
   0x9   :  { %s117_s18 = scalar_lea.vmem %s18_s10, 256  ;;  %p122_p4 = scmp.lt.s32.totalorder %s18_s10, %s18_s10 }
   0xa   :  { %p118_p3 = scmp.ne.s32.totalorder %s18_s10, %s117_s18  ;;  %p123_p5 = scmp.lt.s32.totalorder %s117_s18, %s117_s18 }
   0xc   :  { %p124_p6 = por %p123_p5, %p122_p4 }
   0xe   :  { %p125_p7 = pnand %p124_p6, %p118_p3 }
  0x10   :  { %128 = shalt.err (!%p125_p7)
}
  0x11   :  { %20 = dma.hbm_to_vmem [thread:$0]  %s233_s0, 256, %s18_s10, [#allocation3]  }
  0x12   :  { %173 = dma.done.wait [#allocation3], 256  }
  0x13   :  { %174 = vsyncadd [#allocation3], 4294967040  ;;  %vm32_vm0 = vcmask 1043456   ;;  %v24_v0 = vld [vmem:[#allocation2] sm:$0xff]  ;;  %v25_v1 = vld [vmem:[#allocation2 + $0x8] sm:$0xff]  ;;  %s180_s0 = smov [#allocation5]  }
  0x14   :  { %v28_v2 = vcombine.high %v24_v0, %v24_v0  ;;  %v29_v3 = vcombine.high %v25_v1, %v25_v1  ;;  %v33_v4 = vsel %vm32_vm0, %v24_v0, inf  ;;  %v35_v5 = vsel %vm32_vm0, %v25_v1, inf  ;;  %s75_s21 = sshll.u32 %s180_s0, 4  ;;  %s181_s23 = smov [#allocation6]   ;;  %s76_s21 = int_to_ptr.vmem [resolvable:$true] %s75_s21 }
  0x15   :  { %v51_v6 = vsel %vm32_vm0, %v24_v0, -inf  ;;  %v53_v7 = vsel %vm32_vm0, %v25_v1, -inf  ;;  %s85_s24 = sshll.u32 %s181_s23, 4  ;;  %s129_s25 = scalar_lea.vmem %s76_s21, 128  ;;  %s86_s24 = int_to_ptr.vmem [resolvable:$true] %s85_s24 }
  0x16   :  { %v34_v8 = vsel %vm32_vm0, %v28_v2, inf  ;;  %v36_v9 = vsel %vm32_vm0, %v29_v3, inf  ;;  %v52_v10 = vsel %vm32_vm0, %v28_v2, -inf  ;;  %v54_v11 = vsel %vm32_vm0, %v29_v3, -inf  ;;  %p130_p8 = scmp.ne.s32.totalorder %s76_s21, %s129_s25  ;;  %p134_p9 = scmp.lt.s32.totalorder %s76_s21, %s76_s21 }
  0x17   :  { %v37_v12 = vmin.f32 %v33_v4, %v34_v8  ;;  %v38_v13 = vmin.f32 %v35_v5, %v36_v9  ;;  %v55_v14 = vmax.f32 %v51_v6, %v52_v10  ;;  %v56_v15 = vmax.f32 %v53_v7, %v54_v11  ;;  %p135_p10 = scmp.lt.s32.totalorder %s129_s25, %s129_s25 }
  0x19   :  { %v39_v16 = vmin.f32 %v37_v12, %v38_v13  ;;  %v57_v17 = vmax.f32 %v55_v14, %v56_v15  ;;  %p136_p11 = por %p135_p10, %p134_p9 }
  0x1b   :  { %40 = vmin.xlane.f32.xlu0 %v39_v16  ;;  %p137_p12 = pnand %p136_p11, %p130_p8 }
  0x1f   :  { %58 = vmax.xlane.f32.xlu0 %v57_v17 }
  0xa8   :  { %v41_v18 = vpop.xlane.xlu0 %40 }
  0xa9   :  { %v42_v19 = vrot.slane %v41_v18, 4 }
  0xab   :  { %v43_v20 = vmin.f32 %v41_v18, %v42_v19 }
  0xac   :  { %v59_v21 = vpop.xlane.xlu0 %58 }
  0xad   :  { %v44_v22 = vrot.slane %v43_v20, 2  ;;  %v60_v23 = vrot.slane %v59_v21, 4 }
  0xaf   :  { %v61_v24 = vmax.f32 %v59_v21, %v60_v23  ;;  %v45_v25 = vmin.f32 %v43_v20, %v44_v22 }
  0xb1   :  { %v62_v26 = vrot.slane %v61_v24, 2  ;;  %v46_v27 = vrot.slane %v45_v25, 1 }
  0xb3   :  { %v63_v28 = vmax.f32 %v61_v24, %v62_v26  ;;  %v47_v29 = vmin.f32 %v45_v25, %v46_v27 }
  0xb5   :  { %98 = vpush %v47_v29  ;;  %v64_v30 = vrot.slane %v63_v28, 1 }
  0xb7   :  { %v65_v31 = vmax.f32 %v63_v28, %v64_v30 }
  0xb9   :  { %100 = vpush %v65_v31 }
  0xe6   :  { %s99_s22 = spop %98 }
  0xe7   :  { %v49_v32 = vstv %s99_s22 }
  0xe8   :  { %50 = vst [vmem:[#allocation5] sm:$0xff] %v49_v32 }
  0xe9   :  { %140 = shalt.err (!%p137_p12)
}
  0xea   :  { %s141_s28 = scalar_lea.hbm %s234_s1, 128 }
  0xeb   :  { %p142_p13 = scmp.ne.s32.totalorder %s234_s1, %s141_s28  ;;  %p145_p0 = scmp.lt.u32.totalorder %s141_s28, %s234_s1 }
  0xed   :  { %p147_p1 = pnand %p145_p0, %p142_p13 }
  0xef   :  { %150 = shalt.err (!%p147_p1)
}
  0xf0   :  { %78 = dma.vmem_to_hbm [thread:$0]  %s76_s21, 128, %s234_s1, [#allocation4]  }
  0xf1   :  { %s101_s7 = spop %100  ;;  %s151_s8 = scalar_lea.vmem %s86_s24, 128 }
  0xf2   :  { %v67_v33 = vstv %s101_s7  ;;  %p152_p2 = scmp.ne.s32.totalorder %s86_s24, %s151_s8  ;;  %p156_p3 = scmp.lt.s32.totalorder %s86_s24, %s86_s24 }
  0xf3   :  { %68 = vst [vmem:[#allocation6] sm:$0xff] %v67_v33  ;;  %p157_p4 = scmp.lt.s32.totalorder %s151_s8, %s151_s8 }
  0xf5   :  { %p158_p5 = por %p157_p4, %p156_p3 }
  0xf7   :  { %p159_p6 = pnand %p158_p5, %p152_p2 }
  0xf9   :  { %162 = shalt.err (!%p159_p6)
}
  0xfa   :  { %s163_s11 = scalar_lea.hbm %s235_s2, 128 }
  0xfb   :  { %p164_p7 = scmp.ne.s32.totalorder %s235_s2, %s163_s11  ;;  %p167_p8 = scmp.lt.u32.totalorder %s163_s11, %s235_s2 }
  0xfd   :  { %p169_p9 = pnand %p167_p8, %p164_p7 }
  0xff   :  { %172 = shalt.err (!%p169_p9)
}
 0x100   :  { %88 = dma.vmem_to_hbm [thread:$0]  %s86_s24, 128, %s235_s2, [#allocation7]  }
 0x101   :  { %175 = dma.done.wait [#allocation4], 128  }
 0x102   :  { %176 = vsyncadd [#allocation4], 4294967168 }
 0x103   :  { %177 = dma.done.wait [#allocation7], 128  }
 0x104   :  { %178 = vsyncadd [#allocation7], 4294967168 }
 0x105   :  { %95 = vsyncpa [#allocation3], 1 }
 0x106   :  { %96 = vsyncpa [#allocation4], 1 }
 0x107   :  { %97 = vsyncpa [#allocation7], 1 }

</bundles_post_ra>
